<compile_context>
chip_gen: v5e
topology: v5e:2x2
jax: 0.10.0
libtpu: 0.0.40
codegen_flags: <defaults>
</compile_context>

<pallas_src>
import jax
import jax.numpy as jnp
from jax.experimental import pallas as pl
from jax.experimental.pallas import tpu as pltpu

NUM_PARAMS = 16


def _identity_kernel(params_ref, out_ref):
    # Entire forward pass is "return the parameter tensor": one tiny copy of
    # a (1, 16) f32 tile already resident in VMEM. Output buffer aliases the
    # input buffer (input_output_aliases at the call site), so this is the
    # minimum possible work for a mandatory kernel boundary.
    out_ref[...] = params_ref[...]


def learnable_params_forward(params: jax.Array) -> jax.Array:
    """Fast path: PyTorch's forward() just returns the Parameter — no kernel."""
    assert params.shape == (NUM_PARAMS,)
    return params


def learnable_params_forward_pallas(params: jax.Array) -> jax.Array:
    """Kernel-boundary variant (only if a pallas_call is required by the caller)."""
    assert params.shape == (NUM_PARAMS,)
    p2d = params.reshape(1, NUM_PARAMS)  # lane-axis-last 2-D presentation
    out = pl.pallas_call(
        _identity_kernel,
        out_shape=jax.ShapeDtypeStruct((1, NUM_PARAMS), params.dtype),
        in_specs=[pl.BlockSpec(memory_space=pltpu.VMEM)],
        out_specs=pl.BlockSpec(memory_space=pltpu.VMEM),
        # Output aliases the parameter buffer: no new HBM allocation, no
        # extra materialization beyond the (unavoidable) VMEM round-trip.
        input_output_aliases={0: 0},
    )(p2d)
    return out.reshape(NUM_PARAMS)


def init_params() -> jax.Array:
    # Deterministic init matching torch.full((16,), 0.5).
    return jnp.full((NUM_PARAMS,), 0.5, dtype=jnp.float32)


if __name__ == "__main__":
    # PRNGKey(0) kept for convention; the module's init is deterministic
    # (constant 0.5 fill), so no random weights are actually needed.
    _ = jax.random.PRNGKey(0)

    params = init_params()

    # Production fast path (no kernel): exact module semantics.
    out_fast = jax.block_until_ready(learnable_params_forward(params))

    # Kernel-boundary path: run the Pallas kernel once and validate.
    out_kernel = jax.block_until_ready(learnable_params_forward_pallas(params))

    for out in (out_fast, out_kernel):
        assert out.shape == (NUM_PARAMS,)
        assert out.dtype == jnp.float32
        assert bool(jnp.all(out == 0.5))

    print("KERNEL_OK")
</pallas_src>

<mosaic_0001>
module attributes {stable_mosaic.version = 11 : i64} {
  func.func @_identity_kernel(%arg0: memref<1x16xf32, #tpu.memory_space<vmem>>, %arg1: memref<1x16xf32, #tpu.memory_space<vmem>>) attributes {dimension_semantics = [], scalar_prefetch = 0 : i64, scratch_operands = 0 : i64, tpu.core_type = #tpu.core_type<tc>} {
    %c0 = arith.constant 0 : index
    %c0_0 = arith.constant 0 : index
    %0 = vector.load %arg0[%c0, %c0_0] : memref<1x16xf32, #tpu.memory_space<vmem>>, vector<1x16xf32>
    %c0_1 = arith.constant 0 : index
    %c0_2 = arith.constant 0 : index
    %1 = vector.load %arg1[%c0_1, %c0_2] : memref<1x16xf32, #tpu.memory_space<vmem>>, vector<1x16xf32>
    tpu.vector_store %arg1[%c0_1, %c0_2], %0 {strides = array<i32>} : memref<1x16xf32, #tpu.memory_space<vmem>>, vector<1x16xf32>,
    return
  }
}

</mosaic_0001>

<bundles_post_ra>
// kernel: tpu_custom_call.1
= control target key start
LH: loop header
LB: loop body
LE: loop exit
PB: predicated region body
PF: predicated region fallthrough
CT: control target
= control target key end

     0   :  { %6 = vsyncpa [#allocation3], 0  ;;  %s115_s0 = inlined_call_operand.hbm [shape: f32[1,16], index: 0, kind: input, shape index: {}, may-alias: {0,1}]   ;;  %s116_s1 = inlined_call_operand.hbm [shape: f32[1,16], index: 1, kind: output, shape index: {}, may-alias: {0,1}]  }
   0x1   :  { %7 = vsyncpa [#allocation4], 0  ;;  %s13_s8 = sshll.u32 %s115_s0, 4  ;;  %s97_s9 = smov [#allocation2]   ;;  %s14_s8 = int_to_ptr.hbm [resolvable:$true] %s13_s8 }
   0x2   :  { %s15_s10 = sshll.u32 %s97_s9, 4  ;;  %s16_s10 = int_to_ptr.vmem [resolvable:$true] %s15_s10 }
   0x3   :  { %18 = dma.hbm_to_vmem [thread:$0]  %s14_s8, 16, %s16_s10, [#allocation3]  }
   0x4   :  { %93 = dma.done.wait [#allocation3], 16  }
   0x5   :  { %94 = vsyncadd [#allocation3], 4294967280  ;;  %s98_s11 = smov [#allocation5]   ;;  %s33_s15 = sshll.u32 %s116_s1, 4  ;;  %vm24_vm0 = vcmask 122880   ;;  %s34_s15 = int_to_ptr.hbm [resolvable:$true] %s33_s15 }
   0x6   :  { %s31_s12 = sshll.u32 %s98_s11, 4  ;;  %v23_v0 = vld [vmem:[#allocation2] sm:$0x1]  ;;  %s32_s12 = int_to_ptr.vmem [resolvable:$true] %s31_s12 }
   0x7   :  { %25 = vst.msk [vmem:[#allocation5] sm:$0x1] %vm24_vm0, %v23_v0 }
   0x8   :  { %36 = dma.vmem_to_hbm [thread:$0]  %s32_s12, 16, %s34_s15, [#allocation4]  }
   0x9   :  { %95 = dma.done.wait [#allocation4], 16  }
   0xa   :  { %96 = vsyncadd [#allocation4], 4294967280 }
   0xb   :  { %41 = vsyncpa [#allocation3], 1 }
   0xc   :  { %42 = vsyncpa [#allocation4], 1 }

</bundles_post_ra>
